<compile_context>
chip_gen: v6e
topology: v6e:2x2x1
jax: 0.10.0
libtpu: 0.0.40
codegen_flags: <defaults>
</compile_context>

<pallas_src>
import functools

import jax
import jax.numpy as jnp
from jax.experimental import pallas as pl
from jax.experimental.pallas import tpu as pltpu


def _round_up(x, m):
    return ((x + m - 1) // m) * m


def _focal_loss_kernel(logit_ref, target_ref, sum_ref, cnt_ref, *,
                       gamma, alpha, n_rows, n_cols):
    x = logit_ref[...].astype(jnp.float32)
    t = target_ref[...].astype(jnp.float32)
    rt, cpad = x.shape

    # Numerically-stable log-sigmoid formulation:
    #   e        = exp(-|x|)                       (EUP)
    #   log p    = min(x, 0) - log1p(e)            (EUP log1p)
    #   log(1-p) = log sigmoid(-x) = log p - x     (VPU)
    #   r        = 1 / (1 + e)                     (EUP approx reciprocal)
    #   p        = r    if x >= 0 else e*r
    #   1 - p    = e*r  if x >= 0 else r
    neg_abs = -jnp.abs(x)
    e = jnp.exp(neg_abs)
    log_p = jnp.where(x >= 0.0, 0.0, x) - jnp.log1p(e)
    log_1mp = log_p - x
    r = pl.reciprocal(1.0 + e, approx=True)
    p = jnp.where(x >= 0.0, r, e * r)
    one_m_p = jnp.where(x >= 0.0, e * r, r)

    # Integer gamma (default 2.0) -> VPU multiplies instead of float pow
    # (pow would lower to exp(gamma*log(x)): 2 extra EUP ops each).
    g = float(gamma)
    if g.is_integer() and 0.0 <= g <= 8.0:
        gi = int(g)
        if gi == 0:
            pow_1mp = jnp.ones_like(p)
            pow_p = jnp.ones_like(p)
        else:
            pow_1mp, pow_p = one_m_p, p
            for _ in range(gi - 1):
                pow_1mp = pow_1mp * one_m_p
                pow_p = pow_p * p
    else:
        pow_1mp = one_m_p ** g
        pow_p = p ** g

    # loss = -alpha*t*(1-p)^g*log(p) - (1-alpha)*(1-t)*p^g*log(1-p)
    loss = (-alpha) * t * pow_1mp * log_p + (alpha - 1.0) * (1.0 - t) * pow_p * log_1mp
    pos = t > 0.0

    # Tail masking (replaces wrapper-side jnp.pad).  Statically skipped when
    # the shapes are already tile-aligned.  Use selects (not multiplies) so
    # garbage in Pallas' padded tail region (possibly NaN/Inf) cannot leak.
    valid = None
    if n_rows % rt != 0:
        row0 = pl.program_id(0) * rt
        rows = jax.lax.broadcasted_iota(jnp.int32, (rt, cpad), 0) + row0
        valid = rows < n_rows
    if n_cols != cpad:
        cols = jax.lax.broadcasted_iota(jnp.int32, (rt, cpad), 1)
        cmask = cols < n_cols
        valid = cmask if valid is None else jnp.logical_and(valid, cmask)
    if valid is not None:
        loss = jnp.where(valid, loss, 0.0)
        pos = jnp.logical_and(pos, valid)
    pos_i = pos.astype(jnp.int32)

    # Reduce the (rt, cpad) block to one lane-dense (8, 128) partial:
    #   * sublane fold: (rt, cpad) -> (rt//8, 8, cpad) is a free vreg
    #     reinterpretation; summing the leading axis is pure cross-vreg VPU adds.
    #   * lane fold: add vreg-aligned 128-lane slices (no XLU).
    def _fold(a):
        a8 = jnp.sum(a.reshape(rt // 8, 8, cpad), axis=0)
        acc = a8[:, 0:128]
        for j in range(1, cpad // 128):
            acc = acc + a8[:, j * 128:(j + 1) * 128]
        return acc

    sum_ref[...] = _fold(loss).reshape(1, 8, 128)
    cnt_ref[...] = _fold(pos_i).reshape(1, 8, 128)


def sigmoid_focal_loss(logit, target, gamma=2.0, alpha=0.25, row_tile=None):
    assert logit.shape == target.shape
    assert logit.ndim == 2, "kernel wrapper expects (N, C) inputs"
    N, C = logit.shape
    C_pad = _round_up(C, 128)

    # Generation-aware VMEM budget: v7x has 64 MiB physical VMEM per TC,
    # v5e/v6e have 128 MiB.  Use half of physical, capped at 64 MiB.
    vmem_cap = 128 * 1024 * 1024
    try:
        cap = getattr(pltpu.get_tpu_info(), "vmem_capacity_bytes", None)
        if cap:
            vmem_cap = int(cap)
    except Exception:
        pass
    vmem_limit = max(16 * 1024 * 1024, min(64 * 1024 * 1024, vmem_cap // 2))

    if row_tile is None:
        # Budget: 2 pipeline buffers x (logit + target) per row, plus ~12 live
        # f32 temporaries of the elementwise chain, against 75% of the limit.
        in_bytes = logit.dtype.itemsize + target.dtype.itemsize
        per_row_bytes = 2 * in_bytes * C_pad + 12 * 4 * C_pad
        budget = (3 * vmem_limit) // 4
        row_tile = budget // per_row_bytes
        row_tile = max(8, min(4096, (row_tile // 8) * 8))
        # TODO(synk): extremely wide C (C_pad * 64 B/row > budget) would need an
        # additional grid axis over C; not required for realistic class counts.

    n_ceil = _round_up(N, 8)
    # Keep at least 2 grid blocks when there is enough work so the "parallel"
    # grid axis can shard across v7x's two TensorCores (costs one extra
    # ~0.35 us step on single-TC v5e/v6e -- negligible).
    if n_ceil > 8:
        row_tile = min(row_tile, _round_up(pl.cdiv(n_ceil, 2), 8))
    row_tile = min(row_tile, n_ceil)
    row_tile = max(8, (row_tile // 8) * 8)
    num_blocks = pl.cdiv(N, row_tile)

    kernel = functools.partial(_focal_loss_kernel, gamma=float(gamma),
                               alpha=float(alpha), n_rows=N, n_cols=C)

    psum, pcnt = pl.pallas_call(
        kernel,
        out_shape=(
            jax.ShapeDtypeStruct((num_blocks, 8, 128), jnp.float32),
            jax.ShapeDtypeStruct((num_blocks, 8, 128), jnp.int32),
        ),
        grid_spec=pltpu.PrefetchScalarGridSpec(
            num_scalar_prefetch=0,
            grid=(num_blocks,),
            in_specs=[
                pl.BlockSpec((row_tile, C_pad), lambda i: (i, 0)),
                pl.BlockSpec((row_tile, C_pad), lambda i: (i, 0)),
            ],
            out_specs=(
                pl.BlockSpec((1, 8, 128), lambda i: (i, 0, 0)),
                pl.BlockSpec((1, 8, 128), lambda i: (i, 0, 0)),
            ),
        ),
        compiler_params=pltpu.CompilerParams(
            dimension_semantics=("parallel",),      # blocks are independent
            vmem_limit_bytes=vmem_limit,
        ),
    )(logit, target)

    # Tiny final reduce + PyTorch denominator in plain JAX.
    total = jnp.sum(psum)
    num_pos = jnp.sum(pcnt).astype(jnp.float32)       # exact: int32 partials
    # torch.nonzero(target > 0) on a 2-D target returns (k, 2); .squeeze(1)
    # is a no-op, so pos_inds.numel() == 2*k, and N == target.size(0).
    return total / (2.0 * num_pos + float(N))


def _reference(logit, target, gamma=2.0, alpha=0.25):
    # Numerically-stable pure-JAX mirror of the PyTorch module's math
    # (identical to the torch formula for non-saturated logits).
    x = logit.astype(jnp.float32)
    t = target.astype(jnp.float32)
    p = jax.nn.sigmoid(x)
    log_p = jax.nn.log_sigmoid(x)
    log_1mp = jax.nn.log_sigmoid(-x)
    term1 = (1.0 - p) ** gamma * log_p
    term2 = p ** gamma * log_1mp
    loss = -t * term1 * alpha - (1.0 - t) * term2 * (1.0 - alpha)
    num_pos = jnp.sum(t > 0)
    return jnp.sum(loss) / (num_pos * 2 + t.shape[0])


if __name__ == "__main__":
    key = jax.random.PRNGKey(0)
    k1, k2, k3, k4 = jax.random.split(key, 4)

    # Test 1: aligned f32 shapes, mild logits (directly matches the PyTorch
    # formula).  Loose-ish rtol accounts for the approx EUP reciprocal.
    N1, C1 = 16, 128
    logit1 = jax.random.normal(k1, (N1, C1), dtype=jnp.float32)
    target1 = (jax.random.uniform(k2, (N1, C1)) > 0.7).astype(jnp.float32)
    out1 = jax.block_until_ready(sigmoid_focal_loss(logit1, target1))
    ref1 = jax.block_until_ready(_reference(logit1, target1))
    assert jnp.allclose(out1, ref1, rtol=1e-2, atol=1e-5), (out1, ref1)

    # Test 2: unaligned shapes (exercises the in-kernel tail masks), bf16
    # inputs (bandwidth path) and saturated logits (stable log-sigmoid path).
    N2, C2 = 13, 100
    logit2 = (35.0 * jax.random.normal(k3, (N2, C2), dtype=jnp.float32)
              ).astype(jnp.bfloat16)
    target2 = (jax.random.uniform(k4, (N2, C2)) > 0.7).astype(jnp.bfloat16)
    out2 = jax.block_until_ready(sigmoid_focal_loss(logit2, target2))
    ref2 = jax.block_until_ready(
        _reference(logit2.astype(jnp.float32), target2.astype(jnp.float32)))
    assert jnp.allclose(out2, ref2, rtol=1e-2, atol=1e-4), (out2, ref2)

    print("KERNEL_OK")
</pallas_src>

<mosaic_0001>
module attributes {stable_mosaic.version = 11 : i64} {
  func.func @_focal_loss_kernel(%arg0: i32, %arg1: memref<8x128xf32, #tpu.memory_space<vmem>>, %arg2: memref<8x128xf32, #tpu.memory_space<vmem>>, %arg3: memref<1x8x128xf32, #tpu.memory_space<vmem>>, %arg4: memref<1x8x128xi32, #tpu.memory_space<vmem>>) attributes {dimension_semantics = [#tpu.dimension_semantics<parallel>], iteration_bounds = array<i64: 2>, scalar_prefetch = 0 : i64, scratch_operands = 0 : i64, tpu.core_type = #tpu.core_type<tc>, window_params = [{transform_indices = @transform_0, window_bounds = array<i64: 8, 128>}, {transform_indices = @transform_1, window_bounds = array<i64: 8, 128>}, {transform_indices = @transform_2, window_bounds = array<i64: 1, 8, 128>}, {transform_indices = @transform_3, window_bounds = array<i64: 1, 8, 128>}]} {
    %c0 = arith.constant 0 : index
    %c0_0 = arith.constant 0 : index
    %0 = vector.load %arg1[%c0, %c0_0] : memref<8x128xf32, #tpu.memory_space<vmem>>, vector<8x128xf32>
    %c0_1 = arith.constant 0 : index
    %c0_2 = arith.constant 0 : index
    %1 = vector.load %arg2[%c0_1, %c0_2] : memref<8x128xf32, #tpu.memory_space<vmem>>, vector<8x128xf32>
    %2 = math.absf %0 : vector<8x128xf32>
    %cst = arith.constant 0.000000e+00 : f32
    %3 = vector.broadcast %cst : f32 to vector<8x128xf32>
    %4 = arith.subf %3, %2 : vector<8x128xf32>
    %5 = math.exp %4 : vector<8x128xf32>
    %cst_3 = arith.constant 0.000000e+00 : f32
    %6 = vector.broadcast %cst_3 : f32 to vector<8x128xf32>
    %7 = arith.cmpf oge, %0, %6 : vector<8x128xf32>
    %cst_4 = arith.constant 0.000000e+00 : f32
    %8 = vector.broadcast %cst_4 : f32 to vector<8x128xf32>
    %9 = arith.select %7, %8, %0 : vector<8x128xi1>, vector<8x128xf32>
    %10 = math.log1p %5 : vector<8x128xf32>
    %11 = arith.subf %9, %10 : vector<8x128xf32>
    %12 = arith.subf %11, %0 : vector<8x128xf32>
    %cst_5 = arith.constant 1.000000e+00 : f32
    %13 = vector.broadcast %cst_5 : f32 to vector<8x128xf32>
    %14 = arith.addf %13, %5 : vector<8x128xf32>
    %15 = tpu.reciprocal %14 {approx = true} : vector<8x128xf32> -> vector<8x128xf32>
    %cst_6 = arith.constant 0.000000e+00 : f32
    %16 = vector.broadcast %cst_6 : f32 to vector<8x128xf32>
    %17 = arith.cmpf oge, %0, %16 : vector<8x128xf32>
    %18 = arith.mulf %5, %15 : vector<8x128xf32>
    %19 = arith.select %17, %15, %18 : vector<8x128xi1>, vector<8x128xf32>
    %cst_7 = arith.constant 0.000000e+00 : f32
    %20 = vector.broadcast %cst_7 : f32 to vector<8x128xf32>
    %21 = arith.cmpf oge, %0, %20 : vector<8x128xf32>
    %22 = arith.mulf %5, %15 : vector<8x128xf32>
    %23 = arith.select %21, %22, %15 : vector<8x128xi1>, vector<8x128xf32>
    %24 = arith.mulf %23, %23 : vector<8x128xf32>
    %25 = arith.mulf %19, %19 : vector<8x128xf32>
    %cst_8 = arith.constant -2.500000e-01 : f32
    %26 = vector.broadcast %cst_8 : f32 to vector<8x128xf32>
    %27 = arith.mulf %26, %1 : vector<8x128xf32>
    %28 = arith.mulf %27, %24 : vector<8x128xf32>
    %29 = arith.mulf %28, %11 : vector<8x128xf32>
    %cst_9 = arith.constant 1.000000e+00 : f32
    %30 = vector.broadcast %cst_9 : f32 to vector<8x128xf32>
    %31 = arith.subf %30, %1 : vector<8x128xf32>
    %cst_10 = arith.constant -7.500000e-01 : f32
    %32 = vector.broadcast %cst_10 : f32 to vector<8x128xf32>
    %33 = arith.mulf %32, %31 : vector<8x128xf32>
    %34 = arith.mulf %33, %25 : vector<8x128xf32>
    %35 = arith.mulf %34, %12 : vector<8x128xf32>
    %36 = arith.addf %29, %35 : vector<8x128xf32>
    %cst_11 = arith.constant 0.000000e+00 : f32
    %37 = vector.broadcast %cst_11 : f32 to vector<8x128xf32>
    %38 = arith.cmpf ogt, %1, %37 : vector<8x128xf32>
    %39 = arith.extui %38 : vector<8x128xi1> to vector<8x128xi32>
    %40 = vector.shape_cast %36 : vector<8x128xf32> to vector<1x8x128xf32>
    %cst_12 = arith.constant dense<0.000000e+00> : vector<8x128xf32>
    %41 = vector.multi_reduction <add>, %40, %cst_12 [0] : vector<1x8x128xf32> to vector<8x128xf32>
    %42 = vector.shape_cast %41 : vector<8x128xf32> to vector<1x8x128xf32>
    %c0_13 = arith.constant 0 : index
    %c0_14 = arith.constant 0 : index
    %c0_15 = arith.constant 0 : index
    %43 = vector.load %arg3[%c0_13, %c0_14, %c0_15] : memref<1x8x128xf32, #tpu.memory_space<vmem>>, vector<1x8x128xf32>
    tpu.vector_store %arg3[%c0_13, %c0_14, %c0_15], %42 {strides = array<i32>} : memref<1x8x128xf32, #tpu.memory_space<vmem>>, vector<1x8x128xf32>,
    %44 = vector.shape_cast %39 : vector<8x128xi32> to vector<1x8x128xi32>
    %cst_16 = arith.constant dense<0> : vector<8x128xi32>
    %45 = vector.multi_reduction <add>, %44, %cst_16 [0] : vector<1x8x128xi32> to vector<8x128xi32>
    %46 = vector.shape_cast %45 : vector<8x128xi32> to vector<1x8x128xi32>
    %c0_17 = arith.constant 0 : index
    %c0_18 = arith.constant 0 : index
    %c0_19 = arith.constant 0 : index
    %47 = vector.load %arg4[%c0_17, %c0_18, %c0_19] : memref<1x8x128xi32, #tpu.memory_space<vmem>>, vector<1x8x128xi32>
    tpu.vector_store %arg4[%c0_17, %c0_18, %c0_19], %46 {strides = array<i32>} : memref<1x8x128xi32, #tpu.memory_space<vmem>>, vector<1x8x128xi32>,
    return
  }
  func.func @transform_0(%arg0: i32) -> (i32, i32) {
    %c0_i32 = arith.constant 0 : i32
    %c0_i32_0 = arith.constant 0 : i32
    return %arg0, %c0_i32 : i32, i32
  }
  func.func @transform_1(%arg0: i32) -> (i32, i32) {
    %c0_i32 = arith.constant 0 : i32
    %c0_i32_0 = arith.constant 0 : i32
    return %arg0, %c0_i32 : i32, i32
  }
  func.func @transform_2(%arg0: i32) -> (i32, i32, i32) {
    %c0_i32 = arith.constant 0 : i32
    %c0_i32_0 = arith.constant 0 : i32
    %c0_i32_1 = arith.constant 0 : i32
    return %arg0, %c0_i32, %c0_i32_0 : i32, i32, i32
  }
  func.func @transform_3(%arg0: i32) -> (i32, i32, i32) {
    %c0_i32 = arith.constant 0 : i32
    %c0_i32_0 = arith.constant 0 : i32
    %c0_i32_1 = arith.constant 0 : i32
    return %arg0, %c0_i32, %c0_i32_0 : i32, i32, i32
  }
}

</mosaic_0001>

<bundles_post_ra>
// kernel: tpu_custom_call.1
= control target key start
LH: loop header
LB: loop body
LE: loop exit
PB: predicated region body
PF: predicated region fallthrough
CT: control target
= control target key end

     0   :  { %9 = vsyncpa [#allocation3], 0  ;;  %s936_s0 = inlined_call_operand.hbm [shape: f32[16,128], index: 0, kind: input, shape index: {}]   ;;  %s937_s1 = inlined_call_operand.hbm [shape: f32[16,128], index: 1, kind: input, shape index: {}]   ;;  %s938_s2 = inlined_call_operand.hbm [shape: f32[2,8,128], index: 2, kind: output, shape index: {0}]   ;;  %s939_s3 = inlined_call_operand.hbm [shape: s32[2,8,128], index: 3, kind: output, shape index: {1}]  }
   0x1   :  { %11 = vsyncpa [#allocation3 + $0x1], 0 }
   0x2   :  { %12 = vsyncpa [#allocation6], 0 }
   0x3   :  { %14 = vsyncpa [#allocation6 + $0x1], 0 }
   0x4   :  { %15 = vsyncpa [#allocation4], 0 }
   0x5   :  { %17 = vsyncpa [#allocation4 + $0x1], 0 }
   0x6   :  { %18 = vsyncpa [#allocation9], 0 }
   0x7   :  { %20 = vsyncpa [#allocation9 + $0x1], 0  ;;  %s692_s12 = smov 0   ;;  %s694_s13 = smov 0  }
   0x8   :  { %s696_s14 = smov 0   ;;  %s698_s15 = smov 0  }
   0x9 LB: > { %s713_s16 = sadd.s32 4294967295, %s665_s15   ;;  %s430_s17 = sadd.s32 4294967294, %s665_s15   ;;  %s665_s15 = sphi %s698_s15, %s958_s15   ;;  %s661_s14 = sphi %s696_s14, %s957_s14   ;;  %s657_s13 = sphi %s694_s13, %s956_s13   ;;  %s653_s12 = sphi %s692_s12, %s955_s12  }
   0xa   : > { %s717_s18 = sadd.s32 1, %s665_s15   ;;  %s33_s19 = sadd.s32 1, %s661_s14 }
   0xb   : > { %s30_s20 = ssub.s32 %s665_s15, %s717_s18  ;;  %p40_p0 = scmp.ne.s32.totalorder %s661_s14, %s657_s13 }
   0xc   : > { %p31_p1 = scmp.eq.s32.totalorder %s30_s20, 0  ;;  %p41_p2 = scmp.eq.s32.totalorder %s665_s15, 0 }
   0xd   : > { %p46_p3 = scmp.ne.s32.totalorder %s657_s13, %s653_s12  ;;  %p47_p4 = scmp.eq.s32.totalorder %s713_s16, 0 }
   0xe   : > { %s729_s21 = scalar_select %p31_p1, %s661_s14, %s33_s19  }
   0xf   : > { %p731_p5 = por %p41_p2, %p40_p0  ;;  %p735_p6 = por %p47_p4, %p46_p3 }
  0x10   : > { %p96_p7 = scmp.eq.s32.totalorder %s713_s16, 1  ;;  %p102_p8 = scmp.eq.s32.totalorder %s430_s17, 1 }
  0x11   : > { %s943_s23 = scalar_select %p735_p6, 1, 0 }
  0x12   : > { %p470_p10 = scmp.lt.s32.totalorder %s665_s15, 2  ;;  %p742_p11 = por %p96_p7, %p40_p0 }
  0x13   : > { %p746_p12 = por %p102_p8, %p46_p3  ;;  %s751_s26 = sand.u32 1, %s661_s14  }
  0x14   : > { %s944_s24 = scalar_select %p742_p11, 1, 0 }
  0x15   : > { %s945_s25 = scalar_select %p746_p12, 1, 0 }
  0x16   : > { %s434_s27 = sshll.u32 %s665_s15, 7  ;;  %s433_s28 = sshll.u32 %s751_s26, 3 }
  0x17   : > { %s760_s4 = scalar_lea.hbm %s936_s0, %s434_s27  ;;  %s152_s5 = scalar_lea.vmem [#allocation2], %s433_s28 }
  0x18   : > { %s159_s6 = sshll.u32 %s152_s5, 4  ;;  %p766_p13 = pnand %p470_p10, %p731_p5  ;;  %s770_s6 = int_to_ptr.vmem [resolvable:$true] %s159_s6 }
  0x19   : > { %s149_s8 = scalar_lea.sflag [#allocation3], %s751_s26  ;;  %s511_s9 = scalar_lea.hbm %s760_s4, 128 }
  0x1a   : > { %p512_p2 = scmp.ne.s32.totalorder %s760_s4, %s511_s9  ;;  %p513_p3 = pneg %p766_p13 }
  0x1b   : > { %s516_s17 = scalar_lea.hbm %s936_s0, 256  ;;  %p517_p5 = scmp.lt.s32.totalorder %s760_s4, %s936_s0 }
  0x1c   : > { %p514_p4 = pnand %p513_p3, %p512_p2  ;;  %p518_p8 = scmp.lt.s32.totalorder %s516_s17, %s511_s9 }
  0x1e   : > { %p515_p7 = pneg %p514_p4  ;;  %p519_p10 = por %p518_p8, %p517_p5 }
  0x20   : > { %p520_p9 = pnand %p519_p10, %p515_p7 }
  0x22   : > { %523 = shalt.err (!%p520_p9)
}
  0x23   : > { %s524_s22 = scalar_lea.vmem %s770_s6, 128  ;;  %s667_s29 = smov [#allocation2]  }
  0x24   : > { %p525_p0 = scmp.ne.s32.totalorder %s770_s6, %s524_s22  ;;  %s529_s30 = sshll.u32 %s667_s29, 4  ;;  %s530_s30 = int_to_ptr.vmem [resolvable:$false] %s529_s30 }
  0x25   : > { %s531_s5 = scalar_lea.vmem %s530_s30, 256  ;;  %p532_p1 = scmp.lt.s32.totalorder %s770_s6, %s530_s30 }
  0x26   : > { %p527_p2 = pnand %p525_p0, %p513_p3  ;;  %p533_p12 = scmp.lt.s32.totalorder %s531_s5, %s524_s22 }
  0x28   : > { %p528_p4 = pneg %p527_p2  ;;  %p534_p11 = por %p533_p12, %p532_p1 }
  0x2a   : > { %p535_p5 = pnand %p534_p11, %p528_p4 }
  0x2c   : > { %538 = shalt.err (!%p535_p5)
}
  0x2d   : > { %459 = dma.hbm_to_vmem [thread:$0]  (!%p766_p13), %s760_s4, 128, %s770_s6, %s149_s8  }
  0x2e   : > { %p947_p9 = scmp.lt.s32.totalorder %s665_s15, 3  ;;  %p948_p0 = scmp.ge.s32.totalorder %s665_s15, 1 }
  0x2f   : > { %s812_s17 = scalar_lea.hbm %s937_s1, %s434_s27  ;;  %s170_s19 = scalar_lea.vmem [#allocation5], %s433_s28 }
  0x30   : > { %p803_p7 = pnand %p948_p0, %p947_p9  ;;  %s177_s20 = sshll.u32 %s170_s19, 4  ;;  %s178_s20 = int_to_ptr.vmem [resolvable:$true] %s177_s20 }
  0x31   : > { %s167_s4 = scalar_lea.sflag [#allocation6], %s751_s26  ;;  %s539_s6 = scalar_lea.hbm %s812_s17, 128 }
  0x32   : > { %s949_s9 = scalar_select %p803_p7, 1, 0 }
  0x33   : > { %p540_p11 = scmp.ne.s32.totalorder %s812_s17, %s539_s6  ;;  %s544_s29 = scalar_lea.hbm %s937_s1, 256 }
  0x34   : > { %p545_p8 = scmp.lt.s32.totalorder %s812_s17, %s937_s1  ;;  %p546_p10 = scmp.lt.s32.totalorder %s544_s29, %s539_s6 }
  0x35   : > { %p542_p12 = pnand %p540_p11, %p513_p3 }
  0x36   : > { %p547_p2 = por %p546_p10, %p545_p8 }
  0x37   : > { %p543_p1 = pneg %p542_p12 }
  0x39   : > { %p548_p4 = pnand %p547_p2, %p543_p1 }
  0x3b   : > { %551 = shalt.err (!%p548_p4)
}
  0x3c   : > { %s552_s28 = scalar_lea.vmem %s178_s20, 128  ;;  %s668_s26 = smov [#allocation5]  }
  0x3d   : > { %p553_p5 = scmp.ne.s32.totalorder %s178_s20, %s552_s28  ;;  %s557_s5 = sshll.u32 %s668_s26, 4  ;;  %s558_s5 = int_to_ptr.vmem [resolvable:$false] %s557_s5 }
  0x3e   : > { %s559_s10 = scalar_lea.vmem %s558_s5, 256  ;;  %p560_p11 = scmp.lt.s32.totalorder %s178_s20, %s558_s5 }
  0x3f   : > { %p555_p9 = pnand %p553_p5, %p513_p3  ;;  %p561_p12 = scmp.lt.s32.totalorder %s559_s10, %s552_s28 }
  0x41   : > { %p556_p0 = pneg %p555_p9  ;;  %p562_p6 = por %p561_p12, %p560_p11 }
  0x43   : > { %p563_p7 = pnand %p562_p6, %p556_p0 }
  0x45   : > { %566 = shalt.err (!%p563_p7)
}
  0x46   : > { %462 = dma.hbm_to_vmem [thread:$0]  (!%p766_p13), %s812_s17, 128, %s178_s20, %s167_s4  }
  0x47   : > { %p950_p1 = scmp.ne.s32.totalorder %s949_s9, 0 }
  0x48   : > { %s838_s11 = sand.u32 (!%p950_p1), 1, %s657_s13   ;;  %p951_p6 = scmp.ne.s32.totalorder (!%p950_p1), %s943_s23, 0 }
  0x49   : > { %186 = sbr.rel (%p950_p1) target bundleno = 160 (0xa0), region = 28  ;;  %s841_s19 = sshll.u32 (!%p950_p1), %s838_s11, 3 }
  0x4a   : > { %s189_s6 = scalar_lea.sflag (!%p950_p1), [#allocation3], %s838_s11  ;;  %s192_s8 = scalar_lea.vmem (!%p950_p1), [#allocation2], %s841_s19 }
  0x4e   : > { %636 = dma.done.wait (%p951_p6), %s189_s6, 128  }
  0x4f   : > { %638 = vsyncadd (%p951_p6), %s189_s6, 4294967168  ;;  %s198_s7 = scalar_lea.sflag [#allocation6], %s838_s11  ;;  %s201_s9 = scalar_lea.vmem [#allocation5], %s841_s19 }
  0x50   : > { %640 = dma.done.wait (%p951_p6), %s198_s7, 128  }
  0x51   : > { %642 = vsyncadd (%p951_p6), %s198_s7, 4294967168  ;;  %s233_s17 = scalar_lea.vmem [#allocation8], %s841_s19  ;;  %s444_s4 = sshll.u32 %s713_s16, 7  ;;  %v857_v0 = vld [vmem:[%s192_s8] sm:$0xff]  ;;  %v235_v1 = vld [vmem:[%s201_s9] sm:$0xff]  ;;  %v669_v4 = vmov 0  }
  0x52   : > { %s305_s20 = sshll.u32 %s233_s17, 4  ;;  %v236_v2 = vand.u32 2147483647, %v857_v0  ;;  %vm268_vm0 = vcmp.gt.f32.partialorder %v235_v1, 0.0  ;;  %s867_s29 = scalar_lea.hbm %s939_s3, %s444_s4  ;;  %s860_s20 = int_to_ptr.vmem [resolvable:$true] %s305_s20 }
  0x53   : > { %v269_v5 = vsel %vm268_vm0, 1, %v669_v4  ;;  %s279_s27 = scalar_lea.sflag [#allocation9], %s838_s11  ;;  %s567_s30 = scalar_lea.vmem %s860_s20, 128 }
  0x54   : > { %v237_v3 = vsub.f32 0.0, %v236_v2  ;;  %272 = vst [vmem:[%s233_s17] sm:$0xff] %v269_v5  ;;  %p568_p13 = scmp.ne.s32.totalorder %s860_s20, %s567_s30  ;;  %p952_p3 = scmp.ne.s32.totalorder %s944_s24, 0 }
  0x55   : > { %s670_s28 = smov [#allocation8]  }
  0x56   : > { %v238_v6 = vmul.f32 1.442695, %v237_v3  ;;  %p569_p7 = pnand %p568_p13, %p952_p3  ;;  %s571_s26 = sshll.u32 %s670_s28, 4  ;;  %s572_s26 = int_to_ptr.vmem [resolvable:$false] %s571_s26 }
  0x57   : > { %s573_s5 = scalar_lea.vmem %s572_s26, 256  ;;  %p574_p10 = scmp.lt.s32.totalorder %s860_s20, %s572_s26 }
  0x58   : > { %p570_p8 = pneg %p569_p7  ;;  %p575_p2 = scmp.lt.s32.totalorder %s573_s5, %s567_s30 }
  0x5a   : > { %p576_p4 = por %p575_p2, %p574_p10 }
  0x5c   : > { %p577_p5 = pnand %p576_p4, %p570_p8 }
  0x5e   : > { %580 = shalt.err (!%p577_p5)
}
  0x5f   : > { %s581_s10 = scalar_lea.hbm %s867_s29, 128  ;;  %s585_s7 = scalar_lea.hbm %s939_s3, 256 }
  0x60   : > { %p582_p9 = scmp.ne.s32.totalorder %s867_s29, %s581_s10  ;;  %p586_p12 = scmp.lt.s32.totalorder %s867_s29, %s939_s3 }
  0x61   : > { %p587_p1 = scmp.lt.s32.totalorder %s585_s7, %s581_s10 }
  0x62   : > { %p583_p0 = pnand %p582_p9, %p952_p3 }
  0x63   : > { %p588_p6 = por %p587_p1, %p586_p12 }
  0x64   : > { %p584_p11 = pneg %p583_p0 }
  0x66   : > { %p589_p13 = pnand %p588_p6, %p584_p11 }
  0x68   : > { %592 = shalt.err (!%p589_p13)
}
  0x69   : > { %453 = dma.vmem_to_hbm [thread:$0]  (%p952_p3), %s860_s20, 128, %s867_s29, %s279_s27   ;;  %505 = vpow2.f32 %v238_v6  ;;  %vm240_vm1 = vcmp.ge.f32.partialorder %v857_v0, 0.0  ;;  %v263_v13 = vsub.f32 1.0, %v235_v1  ;;  %v260_v20 = vmul.f32 -0.25, %v235_v1 }
  0x6a   : > { %v241_v16 = vsel %vm240_vm1, 0.0, %v857_v0  ;;  %s226_s20 = scalar_lea.vmem [#allocation7], %s841_s19  ;;  %s290_s27 = scalar_lea.hbm %s938_s2, %s444_s4 }
  0x6b   : > { %v264_v21 = vmul.f32 -0.75, %v263_v13  ;;  %s292_s23 = sshll.u32 %s226_s20, 4  ;;  %s274_s30 = scalar_lea.sflag [#allocation4], %s838_s11  ;;  %s894_s23 = int_to_ptr.vmem [resolvable:$true] %s292_s23 }
  0x6c   : > { %s593_s28 = scalar_lea.vmem %s894_s23, 128  ;;  %s671_s19 = smov [#allocation7]  }
  0x6d   : > { %p594_p7 = scmp.ne.s32.totalorder %s894_s23, %s593_s28  ;;  %s597_s26 = sshll.u32 %s671_s19, 4  ;;  %s598_s26 = int_to_ptr.vmem [resolvable:$false] %s597_s26 }
  0x6e   : > { %s599_s5 = scalar_lea.vmem %s598_s26, 256  ;;  %p600_p2 = scmp.lt.s32.totalorder %s894_s23, %s598_s26 }
  0x6f   : > { %p595_p8 = pnand %p594_p7, %p952_p3  ;;  %p601_p4 = scmp.lt.s32.totalorder %s599_s5, %s593_s28 }
  0x71   : > { %p596_p10 = pneg %p595_p8  ;;  %p602_p5 = por %p601_p4, %p600_p2 }
  0x73   : > { %p603_p9 = pnand %p602_p5, %p596_p10 }
  0x76   : > { %v506_v7 = vpop.eup %505 }
  0x77   : > { %v242_v8 = vadd.f32 1.0, %v506_v7  ;;  %v245_v9 = vmul.f32 -0.5, %v506_v7  ;;  %v248_v11 = vand.u32 2147483647, %v506_v7 }
  0x79   : > { %507 = vlog2.f32 %v242_v8  ;;  %v246_v10 = vadd.f32 1.0, %v245_v9  ;;  %vm249_vm2 = vcmp.lt.f32.partialorder %v248_v11, 0.0004427343 }
  0x7a   : > { %509 = vrcp.f32 %v242_v8 }
  0x7b   : > { %v247_v12 = vmul.f32 %v506_v7, %v246_v10 }
  0x86   : > { %v508_v14 = vpop.eup %507 }
  0x87   : > { %v510_v15 = vpop.eup %509  ;;  %v244_v17 = vmul.f32 0.6931472, %v508_v14 }
  0x88   : > { %v255_v18 = vmul.f32 %v510_v15, %v506_v7 }
  0x89   : > { %v250_v19 = vsel %vm249_vm2, %v247_v12, %v244_v17 }
  0x8a   : > { %v251_v22 = vsub.f32 %v241_v16, %v250_v19  ;;  %v256_v23 = vsel %vm240_vm1, %v510_v15, %v255_v18  ;;  %v257_v24 = vsel %vm240_vm1, %v255_v18, %v510_v15 }
  0x8b   : > { %v258_v25 = vmul.f32 %v257_v24, %v257_v24  ;;  %v259_v26 = vmul.f32 %v256_v23, %v256_v23 }
  0x8c   : > { %v252_v27 = vsub.f32 %v251_v22, %v857_v0 }
  0x8d   : > { %v261_v28 = vmul.f32 %v260_v20, %v258_v25  ;;  %v265_v29 = vmul.f32 %v264_v21, %v259_v26 }
  0x8f   : > { %v262_v30 = vmul.f32 %v261_v28, %v251_v22  ;;  %v266_v31 = vmul.f32 %v265_v29, %v252_v27 }
  0x91   : > { %v267_v32 = vadd.f32 %v266_v31, %v262_v30 }
  0x93   : > { %271 = vst [vmem:[%s226_s20] sm:$0xff] %v267_v32 }
  0x94   : > { %606 = shalt.err (!%p603_p9)
}
  0x95   : > { %s607_s16 = scalar_lea.hbm %s290_s27, 128  ;;  %s611_s10 = scalar_lea.hbm %s938_s2, 256 }
  0x96   : > { %p608_p0 = scmp.ne.s32.totalorder %s290_s27, %s607_s16  ;;  %p612_p1 = scmp.lt.s32.totalorder %s290_s27, %s938_s2 }
  0x97   : > { %p613_p6 = scmp.lt.s32.totalorder %s611_s10, %s607_s16 }
  0x98   : > { %p609_p11 = pnand %p608_p0, %p952_p3 }
  0x99   : > { %p614_p13 = por %p613_p6, %p612_p1 }
  0x9a   : > { %p610_p12 = pneg %p609_p11 }
  0x9c   : > { %p615_p7 = pnand %p614_p13, %p610_p12 }
  0x9e   : > { %618 = shalt.err (!%p615_p7)
}
  0x9f   : > { %452 = dma.vmem_to_hbm [thread:$0]  (%p952_p3), %s894_s23, 128, %s290_s27, %s274_s30  }
  0xa0 PF: > { %s317_s7 = sand.u32 1, %s653_s12   ;;  %p953_p8 = scmp.ne.s32.totalorder %s945_s25, 0 }
  0xa1   : > { %p954_p10 = scmp.ge.s32.totalorder %s665_s15, 2  ;;  %s318_s9 = scalar_lea.sflag [#allocation4], %s317_s7 }
  0xa3   : > { %p464_p2 = pnand %p954_p10, %p953_p8 }
  0xa5   : > { %p465_p4 = pneg %p464_p2 }
  0xa7   : > { %644 = dma.done.wait (%p465_p4), %s318_s9, 128  }
  0xa8   : > { %646 = vsyncadd (%p465_p4), %s318_s9, 4294967168  ;;  %s327_s17 = scalar_lea.sflag [#allocation9], %s317_s7 }
  0xa9   : > { %648 = dma.done.wait (%p465_p4), %s327_s17, 128  }
  0xaa   : > { %650 = vsyncadd (%p465_p4), %s327_s17, 4294967168  ;;  %p23_p3 = scmp.ge.s32.totalorder %s717_s18, 4   ;;  %s955_s12 = smov %s657_s13 }
  0xab   : > { %s956_s13 = smov %s661_s14  ;;  %s957_s14 = smov %s729_s21 }
  0xac   : > { %s958_s15 = smov %s717_s18  ;;  %25 = sbr.rel (!%p23_p3) target bundleno = 9 (0x9), region = 103 }
  0xb1   :  { %332 = vsyncpa [#allocation3], 1 }
  0xb2   :  { %334 = vsyncpa [#allocation3 + $0x1], 1 }
  0xb3   :  { %335 = vsyncpa [#allocation6], 1 }
  0xb4   :  { %337 = vsyncpa [#allocation6 + $0x1], 1 }
  0xb5   :  { %338 = vsyncpa [#allocation4], 1 }
  0xb6   :  { %340 = vsyncpa [#allocation4 + $0x1], 1 }
  0xb7   :  { %341 = vsyncpa [#allocation9], 1 }
  0xb8   :  { %343 = vsyncpa [#allocation9 + $0x1], 1 }

</bundles_post_ra>
